<compile_context>
chip_gen: v7x
topology: tpu7x:2x2x1
jax: 0.10.0
libtpu: 0.0.40
codegen_flags: <defaults>
</compile_context>

<pallas_src>
import functools

import jax
import jax.numpy as jnp
from jax.experimental import pallas as pl
from jax.experimental.pallas import tpu as pltpu

_VMEM_LIMIT = 32 * 1024 * 1024   # tiles below are tiny; safe on v5e/v6e/v7x
_NEG_BIG = -1e30
_LANE_CHUNK = 128                # strip-mine width of the source (lane) axis


def _round_up(x, m):
    return ((x + m - 1) // m) * m


def _pick_tiles():
    """Per-generation tile limits (source-lane tile, dst-sublane tile)."""
    try:
        vmem = pltpu.get_tpu_info().vmem_capacity_bytes
    except Exception:  # pragma: no cover - conservative fallback
        vmem = 64 * 1024 * 1024
    # v5e/v6e (128 MiB VMEM): larger source tiles amortize per-grid-step
    # overhead.  v7x (64 MiB VMEM, 3.2 TB/s HBM): keep tiles smaller.
    bn_s_max = 1024 if vmem >= 100 * 1024 * 1024 else 512
    # bn_d=128 keeps each strip-mined logits chunk at <=16 vregs and yields
    # >=2 dst blocks (megacore / 2-TC v7x) whenever nd >= 256.
    bn_d_max = 128
    return bn_s_max, bn_d_max


# ----------------------------------------------------------------------------
# Kernel A: fused source/target projections + per-head linear logit terms.
# ----------------------------------------------------------------------------
def _proj_kernel(x_ref, w_r_ref, w_lt_ref, b_r_ref, b_lt_ref,
                 attlin_row_ref, attlin_col_ref,
                 r_ref, lt_ref, linr_ref, linlt_ref, *, heads, out_ch):
    x = x_ref[...].astype(jnp.bfloat16)                        # [bn_s, Fin]
    r = jax.lax.dot_general(x, w_r_ref[...], (((1,), (0,)), ((), ())),
                            preferred_element_type=jnp.float32) + b_r_ref[...]
    r_ref[...] = r                                             # [bn_s, H*C] f32
    # transposed left projection produced directly by the MXU (no relayout)
    lt = jax.lax.dot_general(w_lt_ref[...], x, (((1,), (1,)), ((), ())),
                             preferred_element_type=jnp.float32) + b_lt_ref[...]
    lt_ref[...] = lt.astype(jnp.bfloat16)                      # [H*C, bn_s] bf16

    # per-head linear logit terms (LeakyReLU(0.2,z) == 0.6*z + 0.4*|z|);
    # attlin_* already carry the 0.6*att factor.
    wr = r * attlin_row_ref[...]                               # [bn_s, H*C]
    wl = lt * attlin_col_ref[...]                              # [H*C, bn_s]
    linr_ref[...] = jnp.concatenate(
        [jnp.sum(wr[:, h * out_ch:(h + 1) * out_ch], axis=1, keepdims=True)
         for h in range(heads)], axis=1)                       # [bn_s, H]
    linlt_ref[...] = jnp.concatenate(
        [jnp.sum(wl[h * out_ch:(h + 1) * out_ch, :], axis=0, keepdims=True)
         for h in range(heads)], axis=0)                       # [H, bn_s]


# ----------------------------------------------------------------------------
# Kernel B: GATv2 attention + aggregation + fused epilogue.
# ----------------------------------------------------------------------------
def _gat_attn_kernel(adj_ref, xr_ref, xlt_ref, linr_ref, linlt_ref,
                     attabs_ref, bias_ref, scale_ref, shift_ref, out_ref,
                     m_sc, l_sc, acc_sc,
                     *, heads, out_ch, concat, apply_bn, is_last, lane_chunk):
    j = pl.program_id(1)

    @pl.when(j == 0)
    def _init():
        m_sc[...] = jnp.full(m_sc.shape, _NEG_BIG, jnp.float32)
        l_sc[...] = jnp.zeros(l_sc.shape, jnp.float32)
        acc_sc[...] = jnp.zeros(acc_sc.shape, jnp.float32)

    xr = xr_ref[...]                                           # [bn_d, H*C] f32
    linr = linr_ref[...]                                       # [bn_d, H]   f32
    bn_s = adj_ref.shape[1]
    n_chunks = bn_s // lane_chunk

    # strip-mine the source (lane) axis so the f32 logits chunk stays in vregs
    for k in range(n_chunks):
        lo = k * lane_chunk
        hi = lo + lane_chunk
        mask = adj_ref[:, lo:hi].astype(jnp.int32) != 0        # [bn_d, chunk]
        xlt_c16 = xlt_ref[:, lo:hi]                            # [H*C, chunk] bf16
        xlt_c = xlt_c16.astype(jnp.float32)
        linlt_c = linlt_ref[:, lo:hi]                          # [H, chunk]

        for h in range(heads):                                 # small static
            # logits: e = 0.6*(lin_r + lin_l) + 0.4 * sum_c a_hc * |xr_c + xl_c|
            e = linr[:, h:h + 1] + linlt_c[h:h + 1, :]         # [bn_d, chunk]
            for c in range(out_ch):                            # small static
                idx = h * out_ch + c
                z = xr[:, idx:idx + 1] + xlt_c[idx:idx + 1, :]
                e = e + jnp.abs(z) * attabs_ref[idx]           # SMEM scalar
            e = jnp.where(mask, e, _NEG_BIG)                   # mask non-edges

            # --- online softmax over the source (lane) axis ---
            m_prev = m_sc[:, h:h + 1]
            m_new = jnp.maximum(m_prev, jnp.max(e, axis=-1, keepdims=True))
            corr = jnp.exp(m_prev - m_new)
            p = jnp.exp(e - m_new)                             # masked -> 0
            l_sc[:, h:h + 1] = corr * l_sc[:, h:h + 1] + jnp.sum(
                p, axis=-1, keepdims=True)
            upd = jax.lax.dot_general(                         # [bn_d, C]
                p.astype(jnp.bfloat16),
                xlt_c16[h * out_ch:(h + 1) * out_ch, :],
                (((1,), (1,)), ((), ())),
                preferred_element_type=jnp.float32)
            acc_sc[:, h * out_ch:(h + 1) * out_ch] = (
                corr * acc_sc[:, h * out_ch:(h + 1) * out_ch] + upd)
            m_sc[:, h:h + 1] = m_new

    @pl.when(j == pl.num_programs(1) - 1)
    def _finalize():
        # isolated/padded rows are guarded; division goes to the EUP
        inv = pl.reciprocal(jnp.maximum(l_sc[...], 1e-20), approx=True)
        acc = acc_sc[...]
        if concat:
            parts = [acc[:, h * out_ch:(h + 1) * out_ch] * inv[:, h:h + 1]
                     for h in range(heads)]
            res = parts[0] if heads == 1 else jnp.concatenate(parts, axis=1)
        else:
            res = acc[:, 0:out_ch] * inv[:, 0:1]
            for h in range(1, heads):
                res = res + acc[:, h * out_ch:(h + 1) * out_ch] * inv[:, h:h + 1]
            res = res * jnp.float32(1.0 / heads)
        res = res + bias_ref[...]
        if apply_bn:                                           # fused BN (eval)
            res = res * scale_ref[...] + shift_ref[...]
        if is_last:                                            # fused log_softmax
            mx = jnp.max(res, axis=-1, keepdims=True)
            s = res - mx
            res = s - jnp.log(jnp.sum(jnp.exp(s), axis=-1, keepdims=True))
        else:                                                  # fused ReLU
            res = jnp.maximum(res, 0.0)
        out_ref[...] = res


# ----------------------------------------------------------------------------
# Layer wrapper
# ----------------------------------------------------------------------------
def gatv2_layer(x, adj, params, *, heads, out_ch, concat, apply_bn,
                bn_params, is_last):
    ns, fin = x.shape
    nd = adj.shape[0]
    hc = heads * out_ch
    out_dim = hc if concat else out_ch

    bn_s_max, bn_d_max = _pick_tiles()
    bn_s = min(bn_s_max, _round_up(ns, 128))    # source axis -> lanes
    bn_d = min(bn_d_max, _round_up(nd, 32))     # target axis -> sublanes
    n_rows = _round_up(ns, bn_s)
    nd_pad = _round_up(nd, bn_d)

    # pad to tile multiples (zero rows/cols are masked away in-kernel)
    x_p = jnp.zeros((n_rows, fin), jnp.float32).at[:ns].set(x)
    adj_p = jnp.zeros((nd_pad, n_rows), jnp.int8).at[:nd, :ns].set(
        adj.astype(jnp.int8))

    # parameters: bf16 for MXU operands, everything else f32
    w_r = params["w_r"].astype(jnp.bfloat16)                   # [Fin, H*C]
    w_lt = params["w_l"].T.astype(jnp.bfloat16)                # [H*C, Fin]
    b_r = params["b_r"].reshape(1, hc).astype(jnp.float32)
    b_lt = params["b_l"].reshape(hc, 1).astype(jnp.float32)
    att = params["att"].reshape(1, hc).astype(jnp.float32)
    att_lin_row = 0.6 * att                                    # linear part
    att_lin_col = att_lin_row.reshape(hc, 1)
    att_abs = (0.4 * att).reshape(hc)                          # abs part (SMEM)
    bias = params["bias"].reshape(1, out_dim).astype(jnp.float32)

    if apply_bn:
        scale = (bn_params["gamma"] /
                 jnp.sqrt(bn_params["var"] + 1e-5)).reshape(1, out_dim)
        scale = scale.astype(jnp.float32)
        shift = (bn_params["beta"].reshape(1, out_dim) -
                 bn_params["mean"].reshape(1, out_dim) * scale)
        shift = shift.astype(jnp.float32)
    else:
        scale = jnp.ones((1, out_dim), jnp.float32)
        shift = jnp.zeros((1, out_dim), jnp.float32)

    # ---- kernel A: projections + per-head linear logit terms ----
    proj_kernel = functools.partial(_proj_kernel, heads=heads, out_ch=out_ch)
    proj_r, proj_lt, lin_r, lin_lt = pl.pallas_call(
        proj_kernel,
        grid=(n_rows // bn_s,),
        in_specs=[
            pl.BlockSpec((bn_s, fin), lambda r: (r, 0)),       # x rows
            pl.BlockSpec((fin, hc), lambda r: (0, 0)),         # W_r
            pl.BlockSpec((hc, fin), lambda r: (0, 0)),         # W_l^T
            pl.BlockSpec((1, hc), lambda r: (0, 0)),           # b_r
            pl.BlockSpec((hc, 1), lambda r: (0, 0)),           # b_l^T
            pl.BlockSpec((1, hc), lambda r: (0, 0)),           # 0.6*att (row)
            pl.BlockSpec((hc, 1), lambda r: (0, 0)),           # 0.6*att (col)
        ],
        out_specs=(
            pl.BlockSpec((bn_s, hc), lambda r: (r, 0)),
            pl.BlockSpec((hc, bn_s), lambda r: (0, r)),
            pl.BlockSpec((bn_s, heads), lambda r: (r, 0)),
            pl.BlockSpec((heads, bn_s), lambda r: (0, r)),
        ),
        out_shape=(
            jax.ShapeDtypeStruct((n_rows, hc), jnp.float32),
            jax.ShapeDtypeStruct((hc, n_rows), jnp.bfloat16),
            jax.ShapeDtypeStruct((n_rows, heads), jnp.float32),
            jax.ShapeDtypeStruct((heads, n_rows), jnp.float32),
        ),
        compiler_params=pltpu.CompilerParams(
            dimension_semantics=("parallel",),
            vmem_limit_bytes=_VMEM_LIMIT),
    )(x_p, w_r, w_lt, b_r, b_lt, att_lin_row, att_lin_col)

    # ---- kernel B: attention + aggregation + fused epilogue ----
    kernel = functools.partial(
        _gat_attn_kernel, heads=heads, out_ch=out_ch, concat=concat,
        apply_bn=apply_bn, is_last=is_last,
        lane_chunk=min(_LANE_CHUNK, bn_s))
    out = pl.pallas_call(
        kernel,
        grid=(nd_pad // bn_d, n_rows // bn_s),
        in_specs=[
            pl.BlockSpec((bn_d, bn_s), lambda i, j: (i, j)),   # adj (int8)
            pl.BlockSpec((bn_d, hc), lambda i, j: (i, 0)),     # proj_r (targets)
            pl.BlockSpec((hc, bn_s), lambda i, j: (0, j)),     # proj_l^T (bf16)
            pl.BlockSpec((bn_d, heads), lambda i, j: (i, 0)),  # lin_r
            pl.BlockSpec((heads, bn_s), lambda i, j: (0, j)),  # lin_l^T
            pl.BlockSpec(memory_space=pltpu.MemorySpace.SMEM), # 0.4*att scalars
            pl.BlockSpec((1, out_dim), lambda i, j: (0, 0)),   # bias
            pl.BlockSpec((1, out_dim), lambda i, j: (0, 0)),   # bn scale
            pl.BlockSpec((1, out_dim), lambda i, j: (0, 0)),   # bn shift
        ],
        out_specs=pl.BlockSpec((bn_d, out_dim), lambda i, j: (i, 0)),
        out_shape=jax.ShapeDtypeStruct((nd_pad, out_dim), jnp.float32),
        scratch_shapes=[
            pltpu.VMEM((bn_d, heads), jnp.float32),   # running max
            pltpu.VMEM((bn_d, heads), jnp.float32),   # running denominator
            pltpu.VMEM((bn_d, hc), jnp.float32),      # running weighted sum
        ],
        compiler_params=pltpu.CompilerParams(
            dimension_semantics=("parallel", "arbitrary"),
            vmem_limit_bytes=_VMEM_LIMIT),
    )(adj_p, proj_r, proj_lt, lin_r, lin_lt, att_abs, bias, scale, shift)

    return out[:nd]


def gatv2_neighsampler_forward(x, adjs, conv_params, bn_params, layer_heads,
                               batchnorm=True):
    """adjs: list of (dense_adj [Nd, Ns], n_dst).  Mirrors module.forward (eval)."""
    num_layers = len(adjs)
    for i, (adj, n_dst) in enumerate(adjs):
        is_last = (i == num_layers - 1)
        use_bn = batchnorm and not is_last
        p = conv_params[i]
        x = gatv2_layer(
            x, adj, p,
            heads=layer_heads[i],
            out_ch=p["att"].shape[1],
            concat=not is_last,                 # last layer averages heads
            apply_bn=use_bn,
            bn_params=bn_params[i] if use_bn else None,
            is_last=is_last)                    # BN/ReLU or log_softmax fused
    return x


# ----------------------------------------------------------------------------
# Deterministic parameter / input construction
# ----------------------------------------------------------------------------
def glorot(key, shape, fan_in, fan_out):
    a = (6.0 / (fan_in + fan_out)) ** 0.5
    return jax.random.uniform(key, shape, jnp.float32, -a, a)


def make_gatv2_params(key, in_ch, out_ch, heads):
    ks = jax.random.split(key, 3)
    hcw = heads * out_ch
    return {
        "w_l": glorot(ks[0], (in_ch, hcw), in_ch, hcw),
        "b_l": jnp.zeros((1, hcw), jnp.float32),
        "w_r": glorot(ks[1], (in_ch, hcw), in_ch, hcw),
        "b_r": jnp.zeros((1, hcw), jnp.float32),
        "att": glorot(ks[2], (heads, out_ch), heads, out_ch),
        "bias": jnp.zeros((1, hcw), jnp.float32),
    }


def make_bn_params(dim):
    return {
        "gamma": jnp.ones((1, dim), jnp.float32),
        "beta": jnp.zeros((1, dim), jnp.float32),
        "mean": jnp.zeros((1, dim), jnp.float32),
        "var": jnp.ones((1, dim), jnp.float32),
    }


def make_dense_adj(key, n_dst, n_src, deg):
    """Dense int8 adjacency adj[dst, src]=1 for sampled edges, plus self-loops."""
    src = jax.random.randint(key, (n_dst, deg), 0, n_src)
    adj = jnp.zeros((n_dst, n_src), jnp.int8)
    adj = adj.at[jnp.repeat(jnp.arange(n_dst), deg), src.reshape(-1)].set(1)
    adj = adj.at[jnp.arange(n_dst), jnp.arange(n_dst)].set(1)
    return adj


# ----------------------------------------------------------------------------
if __name__ == "__main__":
    key = jax.random.PRNGKey(0)
    k_x, k_a0, k_a1, k_p0, k_p1 = jax.random.split(key, 5)

    # module config: num_layers=2, layer_heads=[2, 1], batchnorm=True
    in_ch, hidden_ch, out_ch = 16, 8, 4
    layer_heads = [2, 1]

    # neighbor-sampled sub-graph sizes: hop-0 nodes -> hop-1 targets -> seeds
    N0, N1, N2 = 32, 16, 8

    x = jax.random.normal(k_x, (N0, in_ch), jnp.float32)
    adjs = [
        (make_dense_adj(k_a0, N1, N0, deg=4), N1),   # layer 0: size=(N0, N1)
        (make_dense_adj(k_a1, N2, N1, deg=4), N2),   # layer 1: size=(N1, N2)
    ]

    conv_params = [
        make_gatv2_params(k_p0, in_ch, hidden_ch, layer_heads[0]),          # concat
        make_gatv2_params(k_p1, hidden_ch * layer_heads[0], out_ch,
                          layer_heads[1]),                                   # mean
    ]
    # last layer has concat=False -> output bias has shape [out_channels]
    conv_params[1]["bias"] = jnp.zeros((1, out_ch), jnp.float32)

    bn_params = [make_bn_params(hidden_ch * layer_heads[0])]

    out = gatv2_neighsampler_forward(x, adjs, conv_params, bn_params, layer_heads)
    out = jax.block_until_ready(out)

    assert out.shape == (N2, out_ch), out.shape
    assert bool(jnp.all(jnp.isfinite(out)))
    # rows of log_softmax should sum (in prob space) to ~1
    assert bool(jnp.all(jnp.abs(jnp.sum(jnp.exp(out), axis=-1) - 1.0) < 1e-4))
    print("KERNEL_OK")
</pallas_src>

<mosaic_0001>
module attributes {stable_mosaic.version = 11 : i64} {
  func.func @_proj_kernel(%arg0: i32, %arg1: memref<128x16xf32, #tpu.memory_space<vmem>>, %arg2: memref<16x16xbf16, #tpu.memory_space<vmem>>, %arg3: memref<16x16xbf16, #tpu.memory_space<vmem>>, %arg4: memref<1x16xf32, #tpu.memory_space<vmem>>, %arg5: memref<16x1xf32, #tpu.memory_space<vmem>>, %arg6: memref<1x16xf32, #tpu.memory_space<vmem>>, %arg7: memref<16x1xf32, #tpu.memory_space<vmem>>, %arg8: memref<128x16xf32, #tpu.memory_space<vmem>>, %arg9: memref<16x128xbf16, #tpu.memory_space<vmem>>, %arg10: memref<128x2xf32, #tpu.memory_space<vmem>>, %arg11: memref<2x128xf32, #tpu.memory_space<vmem>>) attributes {dimension_semantics = [#tpu.dimension_semantics<parallel>], iteration_bounds = array<i64: 1>, scalar_prefetch = 0 : i64, scratch_operands = 0 : i64, tpu.core_type = #tpu.core_type<tc>, window_params = [{transform_indices = @transform_0, window_bounds = array<i64: 128, 16>}, {pipeline_mode = #tpu.pipeline_mode<synchronous>, transform_indices = @transform_1, window_bounds = array<i64: 16, 16>}, {pipeline_mode = #tpu.pipeline_mode<synchronous>, transform_indices = @transform_2, window_bounds = array<i64: 16, 16>}, {pipeline_mode = #tpu.pipeline_mode<synchronous>, transform_indices = @transform_3, window_bounds = array<i64: 1, 16>}, {pipeline_mode = #tpu.pipeline_mode<synchronous>, transform_indices = @transform_4, window_bounds = array<i64: 16, 1>}, {pipeline_mode = #tpu.pipeline_mode<synchronous>, transform_indices = @transform_5, window_bounds = array<i64: 1, 16>}, {pipeline_mode = #tpu.pipeline_mode<synchronous>, transform_indices = @transform_6, window_bounds = array<i64: 16, 1>}, {transform_indices = @transform_7, window_bounds = array<i64: 128, 16>}, {transform_indices = @transform_8, window_bounds = array<i64: 16, 128>}, {transform_indices = @transform_9, window_bounds = array<i64: 128, 2>}, {transform_indices = @transform_10, window_bounds = array<i64: 2, 128>}]} {
    %c0 = arith.constant 0 : index
    %c0_0 = arith.constant 0 : index
    %0 = vector.load %arg1[%c0, %c0_0] : memref<128x16xf32, #tpu.memory_space<vmem>>, vector<128x16xf32>
    %1 = arith.truncf %0 : vector<128x16xf32> to vector<128x16xbf16>
    %c0_1 = arith.constant 0 : index
    %c0_2 = arith.constant 0 : index
    %2 = vector.load %arg2[%c0_1, %c0_2] : memref<16x16xbf16, #tpu.memory_space<vmem>>, vector<16x16xbf16>
    %cst = arith.constant dense<0.000000e+00> : vector<128x16xf32>
    %3 = tpu.matmul %1, %2, %cst {dimension_numbers = #tpu.dot_dimension_numbers<[1], [0], [0], [1], [0, 0, 1, 1], [], []>} : vector<128x16xbf16>, vector<16x16xbf16>, vector<128x16xf32> -> vector<128x16xf32>
    %c0_3 = arith.constant 0 : index
    %c0_4 = arith.constant 0 : index
    %4 = vector.load %arg4[%c0_3, %c0_4] : memref<1x16xf32, #tpu.memory_space<vmem>>, vector<1x16xf32>
    %5 = vector.broadcast %4 : vector<1x16xf32> to vector<128x16xf32>
    %6 = arith.addf %3, %5 : vector<128x16xf32>
    %c0_5 = arith.constant 0 : index
    %c0_6 = arith.constant 0 : index
    %7 = vector.load %arg8[%c0_5, %c0_6] : memref<128x16xf32, #tpu.memory_space<vmem>>, vector<128x16xf32>
    tpu.vector_store %arg8[%c0_5, %c0_6], %6 {strides = array<i32>} : memref<128x16xf32, #tpu.memory_space<vmem>>, vector<128x16xf32>,
    %c0_7 = arith.constant 0 : index
    %c0_8 = arith.constant 0 : index
    %8 = vector.load %arg3[%c0_7, %c0_8] : memref<16x16xbf16, #tpu.memory_space<vmem>>, vector<16x16xbf16>
    %cst_9 = arith.constant dense<0.000000e+00> : vector<16x128xf32>
    %9 = tpu.matmul %8, %1, %cst_9 {dimension_numbers = #tpu.dot_dimension_numbers<[1], [1], [0], [0], [0, 0, 1, 0], [], []>} : vector<16x16xbf16>, vector<128x16xbf16>, vector<16x128xf32> -> vector<16x128xf32>
    %c0_10 = arith.constant 0 : index
    %c0_11 = arith.constant 0 : index
    %10 = vector.load %arg5[%c0_10, %c0_11] : memref<16x1xf32, #tpu.memory_space<vmem>>, vector<16x1xf32>
    %11 = vector.broadcast %10 : vector<16x1xf32> to vector<16x128xf32>
    %12 = arith.addf %9, %11 : vector<16x128xf32>
    %13 = arith.truncf %12 : vector<16x128xf32> to vector<16x128xbf16>
    %c0_12 = arith.constant 0 : index
    %c0_13 = arith.constant 0 : index
    %14 = vector.load %arg9[%c0_12, %c0_13] : memref<16x128xbf16, #tpu.memory_space<vmem>>, vector<16x128xbf16>
    tpu.vector_store %arg9[%c0_12, %c0_13], %13 {strides = array<i32>} : memref<16x128xbf16, #tpu.memory_space<vmem>>, vector<16x128xbf16>,
    %c0_14 = arith.constant 0 : index
    %c0_15 = arith.constant 0 : index
    %15 = vector.load %arg6[%c0_14, %c0_15] : memref<1x16xf32, #tpu.memory_space<vmem>>, vector<1x16xf32>
    %16 = vector.broadcast %15 : vector<1x16xf32> to vector<128x16xf32>
    %17 = arith.mulf %6, %16 : vector<128x16xf32>
    %c0_16 = arith.constant 0 : index
    %c0_17 = arith.constant 0 : index
    %18 = vector.load %arg7[%c0_16, %c0_17] : memref<16x1xf32, #tpu.memory_space<vmem>>, vector<16x1xf32>
    %19 = vector.broadcast %18 : vector<16x1xf32> to vector<16x128xf32>
    %20 = arith.mulf %12, %19 : vector<16x128xf32>
    %21 = vector.extract_strided_slice %17 {offsets = [0, 0], sizes = [128, 8], strides = [1, 1]} : vector<128x16xf32> to vector<128x8xf32>
    %cst_18 = arith.constant dense<0.000000e+00> : vector<128xf32>
    %22 = vector.multi_reduction <add>, %21, %cst_18 [1] : vector<128x8xf32> to vector<128xf32>
    %23 = vector.shape_cast %22 : vector<128xf32> to vector<128x1xf32>
    %24 = vector.extract_strided_slice %17 {offsets = [0, 8], sizes = [128, 8], strides = [1, 1]} : vector<128x16xf32> to vector<128x8xf32>
    %cst_19 = arith.constant dense<0.000000e+00> : vector<128xf32>
    %25 = vector.multi_reduction <add>, %24, %cst_19 [1] : vector<128x8xf32> to vector<128xf32>
    %26 = vector.shape_cast %25 : vector<128xf32> to vector<128x1xf32>
    %27 = tpu.concatenate %23, %26 in 1 : vector<128x1xf32>, vector<128x1xf32> -> vector<128x2xf32>
    %c0_20 = arith.constant 0 : index
    %c0_21 = arith.constant 0 : index
    %28 = vector.load %arg10[%c0_20, %c0_21] : memref<128x2xf32, #tpu.memory_space<vmem>>, vector<128x2xf32>
    tpu.vector_store %arg10[%c0_20, %c0_21], %27 {strides = array<i32>} : memref<128x2xf32, #tpu.memory_space<vmem>>, vector<128x2xf32>,
    %29 = vector.extract_strided_slice %20 {offsets = [0, 0], sizes = [8, 128], strides = [1, 1]} : vector<16x128xf32> to vector<8x128xf32>
    %cst_22 = arith.constant dense<0.000000e+00> : vector<128xf32>
    %30 = vector.multi_reduction <add>, %29, %cst_22 [0] : vector<8x128xf32> to vector<128xf32>
    %31 = vector.shape_cast %30 : vector<128xf32> to vector<1x128xf32>
    %32 = vector.extract_strided_slice %20 {offsets = [8, 0], sizes = [8, 128], strides = [1, 1]} : vector<16x128xf32> to vector<8x128xf32>
    %cst_23 = arith.constant dense<0.000000e+00> : vector<128xf32>
    %33 = vector.multi_reduction <add>, %32, %cst_23 [0] : vector<8x128xf32> to vector<128xf32>
    %34 = vector.shape_cast %33 : vector<128xf32> to vector<1x128xf32>
    %35 = tpu.concatenate %31, %34 in 0 : vector<1x128xf32>, vector<1x128xf32> -> vector<2x128xf32>
    %c0_24 = arith.constant 0 : index
    %c0_25 = arith.constant 0 : index
    %36 = vector.load %arg11[%c0_24, %c0_25] : memref<2x128xf32, #tpu.memory_space<vmem>>, vector<2x128xf32>
    tpu.vector_store %arg11[%c0_24, %c0_25], %35 {strides = array<i32>} : memref<2x128xf32, #tpu.memory_space<vmem>>, vector<2x128xf32>,
    return
  }
  func.func @transform_0(%arg0: i32) -> (i32, i32) {
    %c0_i32 = arith.constant 0 : i32
    %c0_i32_0 = arith.constant 0 : i32
    return %arg0, %c0_i32 : i32, i32
  }
  func.func @transform_1(%arg0: i32) -> (i32, i32) {
    %c0_i32 = arith.constant 0 : i32
    %c0_i32_0 = arith.constant 0 : i32
    %c0_i32_1 = arith.constant 0 : i32
    return %c0_i32, %c0_i32_0 : i32, i32
  }
  func.func @transform_2(%arg0: i32) -> (i32, i32) {
    %c0_i32 = arith.constant 0 : i32
    %c0_i32_0 = arith.constant 0 : i32
    %c0_i32_1 = arith.constant 0 : i32
    return %c0_i32, %c0_i32_0 : i32, i32
  }
  func.func @transform_3(%arg0: i32) -> (i32, i32) {
    %c0_i32 = arith.constant 0 : i32
    %c0_i32_0 = arith.constant 0 : i32
    %c0_i32_1 = arith.constant 0 : i32
    return %c0_i32, %c0_i32_0 : i32, i32
  }
  func.func @transform_4(%arg0: i32) -> (i32, i32) {
    %c0_i32 = arith.constant 0 : i32
    %c0_i32_0 = arith.constant 0 : i32
    %c0_i32_1 = arith.constant 0 : i32
    return %c0_i32, %c0_i32_0 : i32, i32
  }
  func.func @transform_5(%arg0: i32) -> (i32, i32) {
    %c0_i32 = arith.constant 0 : i32
    %c0_i32_0 = arith.constant 0 : i32
    %c0_i32_1 = arith.constant 0 : i32
    return %c0_i32, %c0_i32_0 : i32, i32
  }
  func.func @transform_6(%arg0: i32) -> (i32, i32) {
    %c0_i32 = arith.constant 0 : i32
    %c0_i32_0 = arith.constant 0 : i32
    %c0_i32_1 = arith.constant 0 : i32
    return %c0_i32, %c0_i32_0 : i32, i32
  }
  func.func @transform_7(%arg0: i32) -> (i32, i32) {
    %c0_i32 = arith.constant 0 : i32
    %c0_i32_0 = arith.constant 0 : i32
    return %arg0, %c0_i32 : i32, i32
  }
  func.func @transform_8(%arg0: i32) -> (i32, i32) {
    %c0_i32 = arith.constant 0 : i32
    %c0_i32_0 = arith.constant 0 : i32
    return %c0_i32, %arg0 : i32, i32
  }
  func.func @transform_9(%arg0: i32) -> (i32, i32) {
    %c0_i32 = arith.constant 0 : i32
    %c0_i32_0 = arith.constant 0 : i32
    return %arg0, %c0_i32 : i32, i32
  }
  func.func @transform_10(%arg0: i32) -> (i32, i32) {
    %c0_i32 = arith.constant 0 : i32
    %c0_i32_0 = arith.constant 0 : i32
    return %c0_i32, %arg0 : i32, i32
  }
}

</mosaic_0001>

<bundles_post_ra>
// kernel: tpu_custom_call.1
= control target key start
LH: loop header
LB: loop body
LE: loop exit
PB: predicated region body
PF: predicated region fallthrough
CT: control target
= control target key end

     0   :  { %16 = vsyncpa [#allocation3], 0  ;;  %vm72_vm0 = vcmask 130048   ;;  %v706_v8 = vmov 0.0   ;;  %vm707_vm1 = vmmov 0   ;;  %v708_v12 = vmov 0   ;;  %s1180_s0 = inlined_call_operand.vmem [shape: f32[128,16], index: 0, kind: input, shape index: {}]   ;;  %s1181_s1 = inlined_call_operand.vmem [shape: bf16[16,16], index: 1, kind: input, shape index: {}]   ;;  %s1182_s2 = inlined_call_operand.vmem [shape: bf16[16,16], index: 2, kind: input, shape index: {}]   ;;  %s1183_s3 = inlined_call_operand.vmem [shape: f32[1,16], index: 3, kind: input, shape index: {}]   ;;  %s1184_s4 = inlined_call_operand.vmem [shape: f32[16,1], index: 4, kind: input, shape index: {}]   ;;  %s1185_s5 = inlined_call_operand.vmem [shape: f32[1,16], index: 5, kind: input, shape index: {}]   ;;  %s1186_s6 = inlined_call_operand.vmem [shape: f32[16,1], index: 6, kind: input, shape index: {}]   ;;  %s1187_s7 = inlined_call_operand.vmem [shape: f32[128,16], index: 7, kind: output, shape index: {0}]   ;;  %s1188_s8 = inlined_call_operand.hbm [shape: bf16[16,128], index: 8, kind: output, shape index: {1}]   ;;  %s1189_s9 = inlined_call_operand.vmem [shape: f32[128,2], index: 9, kind: output, shape index: {2}]   ;;  %s1190_s10 = inlined_call_operand.hbm [shape: f32[2,128], index: 10, kind: output, shape index: {3}]  }
   0x1   :  { %v656_v0 = vld [vmem:[%s1181_s1] sm:$0xff]   ;;  %v34_v2 = vld [vmem:[%s1180_s0 + $0x8] sm:$0xff]  ;;  %v35_v3 = vld [vmem:[%s1180_s0 + $0x10] sm:$0xff]  ;;  %626 = vmatprep.subr.bf16.mxu1 %v706_v8  ;;  %642 = vmatprep.mubr.msk.bf16.mxu1 %vm707_vm1, %v706_v8 }
   0x2   :  { %v33_v1 = vld [vmem:[%s1180_s0] sm:$0xff]  ;;  %608 = vmatprep.subr.bf16.mxu0 %v656_v0  ;;  %v36_v5 = vld [vmem:[%s1180_s0 + $0x18] sm:$0xff]  ;;  %v38_v7 = vld [vmem:[%s1180_s0 + $0x28] sm:$0xff]  ;;  %654 = vset.pattern.permute.xlu0 %v708_v12 }
   0x3   :  { %v49_v4 = vpack.c.bf16 %v34_v2, %v33_v1  ;;  %v37_v6 = vld [vmem:[%s1180_s0 + $0x20] sm:$0xff]  ;;  %609 = vmatpush3.bf16.msra.mxu0 %v656_v0  ;;  %v50_v9 = vpack.c.bf16 %v36_v5, %v35_v3  ;;  %655 = vset.pattern.permute.xlu1 %v708_v12  ;;  %v39_v13 = vld [vmem:[%s1180_s0 + $0x30] sm:$0xff]  ;;  %v40_v14 = vld [vmem:[%s1180_s0 + $0x38] sm:$0xff] }
   0x4   :  { %v51_v10 = vpack.c.bf16 %v38_v7, %v37_v6  ;;  %v41_v15 = vld [vmem:[%s1180_s0 + $0x40] sm:$0xff]  ;;  %v42_v17 = vld [vmem:[%s1180_s0 + $0x48] sm:$0xff] }
   0x5   :  { %610 = vmatprep.mubr.msk.bf16.mxu0 %vm72_vm0, %v49_v4  ;;  %v74_v11 = vsel %vm72_vm0, %v49_v4, 0  ;;  %v212_v16 = vld [vmem:[%s1184_s4] sm:$0xff] }
   0x6   :  { %627 = vmatpush3.bf16.xpose.msra.mxu1 %v74_v11  ;;  %611 = vmatmul.mubr.msk.bf16.vlgmr.msra.gmra.mrb[0].mxu0 %vm72_vm0, %v50_v9  ;;  %v306_v18 = vld [vmem:[%s1186_s6] sm:$0xff] }
   0x7   :  { %628 = vmatprep.subr.bf16.mxu1 %v706_v8  ;;  %614 = vmatprep.mubr.msk.bf16.mxu0 %vm72_vm0, %v51_v10 }
   0x8   :  { %216 = vperm.xlu0 %654, %v212_v16  }
   0x9   :  { %17 = vsyncpa [#allocation5], 0  ;;  %v213_v19 = vld [vmem:[%s1184_s4 + $0x8] sm:$0xff]  ;;  %310 = vperm.xlu1 %655, %v306_v18   ;;  %v52_v20 = vpack.c.bf16 %v40_v14, %v39_v13  ;;  %v77_v21 = vsel %vm72_vm0, %v50_v9, 0  ;;  %v53_v23 = vpack.c.bf16 %v42_v17, %v41_v15  ;;  %v43_v24 = vld [vmem:[%s1180_s0 + $0x50] sm:$0xff]  ;;  %v80_v29 = vsel %vm72_vm0, %v51_v10, 0 }
   0xa   :  { %v307_v22 = vld [vmem:[%s1186_s6 + $0x8] sm:$0xff]  ;;  %v44_v25 = vld [vmem:[%s1180_s0 + $0x58] sm:$0xff]  ;;  %v45_v26 = vld [vmem:[%s1180_s0 + $0x60] sm:$0xff]  ;;  %vm320_vm2 = vcmask 64512   ;;  %s709_s19 = smov 120   ;;  %vm527_vm3 = vcmask 1040384  }
   0xb   :  { %v46_v27 = vld [vmem:[%s1180_s0 + $0x68] sm:$0xff]  ;;  %v54_v28 = vpack.c.bf16 %v44_v25, %v43_v24  ;;  %v47_v31 = vld [vmem:[%s1180_s0 + $0x70] sm:$0xff]  ;;  %v48_v32 = vld [vmem:[%s1180_s0 + $0x78] sm:$0xff]  ;;  %v83_v33 = vsel %vm72_vm0, %v52_v20, 0  ;;  %v86_v35 = vsel %vm72_vm0, %v53_v23, 0  ;;  %vm481_vm4 = vcmask 7168  }
   0xc   :  { %221 = vperm.xlu0 %654, %v213_v19   ;;  %v55_v30 = vpack.c.bf16 %v46_v27, %v45_v26  ;;  %v56_v34 = vpack.c.bf16 %v48_v32, %v47_v31  ;;  %v657_v39 = vld [vmem:[%s1182_s2] sm:$0xff]   ;;  %vm498_vm5 = vcmask 15360   ;;  %s710_s22 = smov [#allocation2]   ;;  %s711_s4 = smov [#allocation4]  }
   0xd   :  { %315 = vperm.xlu1 %655, %v307_v22   ;;  %v89_v36 = vsel %vm72_vm0, %v54_v28, 0  ;;  %v855_v40 = vld [vmem:[%s1183_s3] ss:$0 sm:$0xff]  ;;  %s537_s1 = sshll.u32 %s710_s22, 4  ;;  %s552_s23 = sshll.u32 %s711_s4, 4  ;;  %s538_s1 = int_to_ptr.vmem [resolvable:$true] %s537_s1  ;;  %s553_s23 = int_to_ptr.vmem [resolvable:$true] %s552_s23 }
   0xe   :  { %629 = vmatpush3.bf16.xpose.msra.mxu1 %v77_v21  ;;  %615 = vmatmul.mubr.msk.bf16.gmra.mrb[4].mxu0 %vm72_vm0, %v52_v20  ;;  %v92_v37 = vsel %vm72_vm0, %v55_v30, 0  ;;  %v95_v38 = vsel %vm72_vm0, %v56_v34, 0  ;;  %v860_v42 = vld [vmem:[%s1185_s5] ss:$0 sm:$0xff]  ;;  %s658_s24 = scalar_lea.vmem %s538_s1, 128  ;;  %p663_p1 = scmp.lt.s32.totalorder %s538_s1, %s538_s1 }
   0xf   :  { %630 = vmatprep.subr.bf16.mxu1 %v706_v8  ;;  %618 = vmatprep.mubr.msk.bf16.mxu0 %vm72_vm0, %v53_v23  ;;  %p659_p0 = scmp.ne.s32.totalorder %s538_s1, %s658_s24  ;;  %p664_p2 = scmp.lt.s32.totalorder %s658_s24, %s658_s24 }
  0x11   :  { %p665_p3 = por %p664_p2, %p663_p1 }
  0x13   :  { %p666_p4 = pnand %p665_p3, %p659_p0 }
  0x16   :  { %631 = vmatpush3.bf16.xpose.msra.mxu1 %v80_v29  ;;  %619 = vmatmul.mubr.msk.bf16.gmra.mrb[8].mxu0 %vm72_vm0, %v54_v28 }
  0x17   :  { %632 = vmatprep.subr.bf16.mxu1 %v706_v8  ;;  %622 = vmatprep.mubr.msk.bf16.mxu0 %vm72_vm0, %v55_v30 }
  0x1e   :  { %633 = vmatpush3.bf16.xpose.msra.mxu1 %v83_v33  ;;  %623 = vmatmul.mubr.msk.bf16.gmra.mrb[12].mxu0 %vm72_vm0, %v56_v34 }
  0x1f   :  { %634 = vmatprep.subr.bf16.mxu1 %v706_v8 }
  0x26   :  { %635 = vmatpush3.bf16.xpose.msra.mxu1 %v86_v35 }
  0x27   :  { %636 = vmatprep.subr.bf16.mxu1 %v706_v8 }
  0x2e   :  { %637 = vmatpush3.bf16.xpose.msra.mxu1 %v89_v36 }
  0x2f   :  { %638 = vmatprep.subr.bf16.mxu1 %v706_v8 }
  0x36   :  { %639 = vmatpush3.bf16.xpose.msra.mxu1 %v92_v37 }
  0x37   :  { %640 = vmatprep.subr.bf16.mxu1 %v706_v8 }
  0x3e   :  { %641 = vmatpush3.bf16.xpose.msra.mxu1 %v95_v38 }
  0x45   :  { %643 = vmatmul.mubr.msk.bf16.vlgmr.msra.gmra.mrb[0].mxu1 %vm72_vm0, %v657_v39 }
  0x87   :  { %v217_v32 = vpop.permute.xlu0 %216 }
  0x88   :  { %v311_v33 = vpop.permute.xlu1 %310 }
  0x8b   :  { %v222_v35 = vpop.permute.xlu0 %221 }
  0xd9   :  { %v612_v41 = vpop.f32.mrb[0].mxu0 }
  0xda   :  { %v140_v43 = vadd.f32 %v612_v41, %v855_v40  ;;  %v131_v44 = vpop.f32.mrb[1].mxu0 }
  0xdb   :  { %v132_v45 = vadd.f32 %v855_v40, %v131_v44  ;;  %v613_v46 = vpop.f32.mrb[2].mxu0 }
  0xdc   :  { %196 = vst.msk [vmem:[%s1187_s7 + $0x10] sm:$0xff] %vm72_vm0, %v140_v43  ;;  %v292_v47 = vmul.f32 %v860_v42, %v140_v43  ;;  %v143_v48 = vadd.f32 %v613_v46, %v855_v40  ;;  %v134_v49 = vpop.f32.mrb[3].mxu0  ;;  %v316_v43 = vpop.permute.xlu1 %315 }
  0xdd   :  { %194 = vst.msk [vmem:[%s1187_s7] sm:$0xff] %vm72_vm0, %v132_v45  ;;  %v135_v50 = vadd.f32 %v855_v40, %v134_v49  ;;  %v290_v51 = vmul.f32 %v860_v42, %v132_v45 }
  0xde   :  { %197 = vst.msk [vmem:[%s1187_s7 + $0x18] sm:$0xff] %vm72_vm0, %v143_v48  ;;  %389 = vrot.lane.b32.xlu1 %v292_v47, %s709_s19  ;;  %v327_v52 = vsel %vm320_vm2, %v292_v47, 0.0  ;;  %v293_v54 = vmul.f32 %v860_v42, %v143_v48 }
  0xdf   :  { %195 = vst.msk [vmem:[%s1187_s7 + $0x8] sm:$0xff] %vm72_vm0, %v135_v50  ;;  %328 = vadd.xlane.f32.xlu0 %v327_v52  ;;  %v321_v55 = vsel %vm320_vm2, %v290_v51, 0.0  ;;  %v291_v3 = vmul.f32 %v860_v42, %v135_v50 }
  0xe0   :  { %v330_v0 = vsel %vm320_vm2, %v293_v54, 0.0 }
  0xe1   :  { %v616_v53 = vpop.f32.mrb[4].mxu0  ;;  %v324_v31 = vsel %vm320_vm2, %v291_v3, 0.0 }
  0xe2   :  { %385 = vrot.lane.b32.xlu1 %v290_v51, %s709_s19  ;;  %v156_v56 = vadd.f32 %v616_v53, %v855_v40  ;;  %v147_v57 = vpop.f32.mrb[5].mxu0 }
  0xe3   :  { %322 = vadd.xlane.f32.xlu0 %v321_v55  ;;  %v148_v58 = vadd.f32 %v855_v40, %v147_v57  ;;  %v617_v59 = vpop.f32.mrb[6].mxu0 }
  0xe4   :  { %200 = vst.msk [vmem:[%s1187_s7 + $0x30] sm:$0xff] %vm72_vm0, %v156_v56  ;;  %v896_v60 = vmul.f32 %v860_v42, %v156_v56  ;;  %v159_v61 = vadd.f32 %v617_v59, %v855_v40  ;;  %v150_v62 = vpop.f32.mrb[7].mxu0 }
  0xe5   :  { %198 = vst.msk [vmem:[%s1187_s7 + $0x20] sm:$0xff] %vm72_vm0, %v148_v58  ;;  %v151_v63 = vadd.f32 %v855_v40, %v150_v62  ;;  %v294_v5 = vmul.f32 %v860_v42, %v148_v58 }
  0xe6   :  { %391 = vrot.lane.b32.xlu1 %v293_v54, %s709_s19  ;;  %201 = vst.msk [vmem:[%s1187_s7 + $0x38] sm:$0xff] %vm72_vm0, %v159_v61  ;;  %v911_v1 = vmul.f32 %v860_v42, %v159_v61  ;;  %v339_v4 = vsel %vm320_vm2, %v896_v60, 0.0 }
  0xe7   :  { %331 = vadd.xlane.f32.xlu0 %v330_v0  ;;  %199 = vst.msk [vmem:[%s1187_s7 + $0x28] sm:$0xff] %vm72_vm0, %v151_v63  ;;  %v918_v2 = vmul.f32 %v860_v42, %v151_v63  ;;  %v333_v11 = vsel %vm320_vm2, %v294_v5, 0.0 }
  0xe8   :  { %v342_v59 = vsel %vm320_vm2, %v911_v1, 0.0 }
  0xe9   :  { %v620_v6 = vpop.f32.mrb[8].mxu0 }
  0xea   :  { %387 = vrot.lane.b32.xlu1 %v291_v3, %s709_s19  ;;  %v172_v7 = vadd.f32 %v620_v6, %v855_v40  ;;  %v163_v8 = vpop.f32.mrb[9].mxu0 }
  0xeb   :  { %340 = vadd.xlane.f32.xlu0 %v339_v4  ;;  %v164_v9 = vadd.f32 %v855_v40, %v163_v8  ;;  %v621_v10 = vpop.f32.mrb[10].mxu0 }
  0xec   :  { %204 = vst.msk [vmem:[%s1187_s7 + $0x50] sm:$0xff] %vm72_vm0, %v172_v7  ;;  %v175_v12 = vadd.f32 %v621_v10, %v855_v40  ;;  %v166_v13 = vpop.f32.mrb[11].mxu0  ;;  %v934_v14 = vmul.f32 %v860_v42, %v172_v7 }
  0xed   :  { %202 = vst.msk [vmem:[%s1187_s7 + $0x40] sm:$0xff] %vm72_vm0, %v164_v9  ;;  %v167_v15 = vadd.f32 %v855_v40, %v166_v13  ;;  %v298_v30 = vmul.f32 %v860_v42, %v164_v9 }
  0xee   :  { %205 = vst.msk [vmem:[%s1187_s7 + $0x58] sm:$0xff] %vm72_vm0, %v175_v12  ;;  %v946_v16 = vmul.f32 %v860_v42, %v175_v12  ;;  %v351_v61 = vsel %vm320_vm2, %v934_v14, 0.0 }
  0xef   :  { %334 = vadd.xlane.f32.xlu0 %v333_v11  ;;  %203 = vst.msk [vmem:[%s1187_s7 + $0x48] sm:$0xff] %vm72_vm0, %v167_v15  ;;  %v953_v17 = vmul.f32 %v860_v42, %v167_v15  ;;  %v345_v50 = vsel %vm320_vm2, %v298_v30, 0.0 }
  0xf0   :  { %v354_v9 = vsel %vm320_vm2, %v946_v16, 0.0 }
  0xf1   :  { %v624_v18 = vpop.f32.mrb[12].mxu0  ;;  %v348_v7 = vsel %vm320_vm2, %v953_v17, 0.0 }
  0xf2   :  { %v188_v19 = vadd.f32 %v624_v18, %v855_v40  ;;  %v179_v20 = vpop.f32.mrb[13].mxu0 }
  0xf3   :  { %v180_v21 = vadd.f32 %v855_v40, %v179_v20  ;;  %v625_v22 = vpop.f32.mrb[14].mxu0 }
  0xf4   :  { %208 = vst.msk [vmem:[%s1187_s7 + $0x70] sm:$0xff] %vm72_vm0, %v188_v19  ;;  %v191_v23 = vadd.f32 %v625_v22, %v855_v40  ;;  %v963_v24 = vmul.f32 %v860_v42, %v188_v19  ;;  %v182_v25 = vpop.f32.mrb[15].mxu0 }
  0xf5   :  { %206 = vst.msk [vmem:[%s1187_s7 + $0x60] sm:$0xff] %vm72_vm0, %v180_v21  ;;  %v970_v26 = vmul.f32 %v860_v42, %v180_v21  ;;  %v183_v27 = vadd.f32 %v855_v40, %v182_v25 }
  0xf6   :  { %209 = vst.msk [vmem:[%s1187_s7 + $0x78] sm:$0xff] %vm72_vm0, %v191_v23  ;;  %v978_v28 = vmul.f32 %v860_v42, %v191_v23  ;;  %v363_v63 = vsel %vm320_vm2, %v963_v24, 0.0 }
  0xf7   :  { %207 = vst.msk [vmem:[%s1187_s7 + $0x68] sm:$0xff] %vm72_vm0, %v183_v27  ;;  %v985_v29 = vmul.f32 %v860_v42, %v183_v27  ;;  %v357_v62 = vsel %vm320_vm2, %v970_v26, 0.0 }
  0xf8   :  { %v366_v12 = vsel %vm320_vm2, %v978_v28, 0.0 }
 0x105   :  { %401 = vrot.lane.b32.xlu0 %v298_v30, %s709_s19 }
 0x10e   :  { %325 = vadd.xlane.f32.xlu1 %v324_v31 }
 0x118   :  { %v266_v34 = vpop.f32.mrb[0].mxu1 }
 0x119   :  { %v267_v36 = vadd.f32 %v266_v34, %v217_v32  ;;  %v644_v37 = vpop.f32.mrb[1].mxu1 }
 0x11a   :  { %v269_v38 = vpop.f32.mrb[2].mxu1 }
 0x11b   :  { %v318_v39 = vmul.f32 %v311_v33, %v267_v36  ;;  %v270_v40 = vadd.f32 %v269_v38, %v222_v35  ;;  %v645_v41 = vpop.f32.mrb[3].mxu1 }
 0x11d   :  { %v515_v44 = vrot.slane %v318_v39, 4  ;;  %v588_v45 = vpack.c.bf16 %v270_v40, %v267_v36  ;;  %v319_v46 = vmul.f32 %v316_v43, %v270_v40 }
 0x11f   :  { %v516_v42 = vadd.f32 %v515_v44, %v318_v39  ;;  %589 = vst [vmem:[#allocation2] sm:$0xff] %v588_v45   ;;  %v521_v47 = vrot.slane %v319_v46, 4  ;;  %397 = vrot.lane.b32.xlu1 %v896_v60, %s709_s19  ;;  %v336_v60 = vsel %vm320_vm2, %v918_v2, 0.0 }
 0x121   :  { %v517_v48 = vrot.slane %v516_v42, 2  ;;  %v522_v49 = vadd.f32 %v521_v47, %v319_v46 }
 0x123   :  { %v518_v51 = vadd.f32 %v517_v48, %v516_v42  ;;  %v523_v52 = vrot.slane %v522_v49, 2  ;;  %393 = vrot.lane.b32.xlu1 %v294_v5, %s709_s19 }
 0x124   :  { %346 = vadd.xlane.f32.xlu0 %v345_v50 }
 0x125   :  { %v524_v53 = vadd.f32 %v523_v52, %v522_v49  ;;  %v519_v54 = vrot.slane %v518_v51, 1 }
 0x127   :  { %v520_v55 = vadd.f32 %v519_v54, %v518_v51  ;;  %v525_v56 = vrot.slane %v524_v53, 1  ;;  %399 = vrot.lane.b32.xlu1 %v911_v1, %s709_s19 }
 0x129   :  { %v526_v57 = vadd.f32 %v525_v56, %v524_v53 }
 0x12b   :  { %v528_v58 = vsel %vm527_vm3, %v520_v55, %v526_v57  ;;  %395 = vrot.lane.b32.xlu1 %v918_v2, %s709_s19 }
 0x12c   :  { %529 = vst [vmem:[#allocation4] sm:$0x3] %v528_v58 }
 0x13a   :  { %415 = vrot.lane.b32.xlu0 %v978_v28, %s709_s19 }
 0x14f   :  { %343 = vadd.xlane.f32.xlu1 %v342_v59 }
 0x150   :  { %v390_v0 = vpop.permute.xlu1 %389 }
 0x151   :  { %v439_v1 = vsel %vm320_vm2, %v390_v0, 0.0 }
 0x153   :  { %337 = vadd.xlane.f32.xlu1 %v336_v60 }
 0x154   :  { %v386_v2 = vpop.permute.xlu1 %385 }
 0x155   :  { %v433_v3 = vsel %vm320_vm2, %v386_v2, 0.0 }
 0x158   :  { %v392_v4 = vpop.permute.xlu1 %391 }
 0x159   :  { %352 = vadd.xlane.f32.xlu0 %v351_v61  ;;  %v442_v15 = vsel %vm320_vm2, %v392_v4, 0.0 }
 0x15c   :  { %v388_v5 = vpop.permute.xlu1 %387 }
 0x15d   :  { %358 = vadd.xlane.f32.xlu0 %v357_v62 }
 0x161   :  { %364 = vadd.xlane.f32.xlu0 %v363_v63 }
 0x164   :  { %405 = vrot.lane.b32.xlu1 %v934_v14, %s709_s19  ;;  %v360_v14 = vsel %vm320_vm2, %v985_v29, 0.0 }
 0x165   :  { %440 = vadd.xlane.f32.xlu0 %v439_v1 }
 0x168   :  { %407 = vrot.lane.b32.xlu1 %v946_v16, %s709_s19 }
 0x169   :  { %434 = vadd.xlane.f32.xlu0 %v433_v3 }
 0x16c   :  { %403 = vrot.lane.b32.xlu1 %v953_v17, %s709_s19  ;;  %v436_v17 = vsel %vm320_vm2, %v388_v5, 0.0  ;;  %v329_v21 = vpop.xlane.xlu0 %328 }
 0x170   :  { %413 = vrot.lane.b32.xlu1 %v963_v24, %s709_s19  ;;  %v323_v22 = vpop.xlane.xlu0 %322 }
 0x174   :  { %409 = vrot.lane.b32.xlu1 %v970_v26, %s709_s19  ;;  %v1040_v23 = vpop.xlane.xlu0 %331 }
 0x178   :  { %411 = vrot.lane.b32.xlu1 %v985_v29, %s709_s19  ;;  %v1042_v24 = vpop.xlane.xlu0 %340 }
 0x17c   :  { %v1044_v25 = vpop.xlane.xlu0 %334 }
 0x180   :  { %v402_v26 = vpop.permute.xlu0 %401 }
 0x181   :  { %v457_v36 = vsel %vm320_vm2, %v402_v26, 0.0 }
 0x19b   :  { %v1024_v6 = vpop.xlane.xlu1 %325 }
 0x19c   :  { %349 = vadd.xlane.f32.xlu1 %v348_v7 }
 0x19f   :  { %v398_v8 = vpop.permute.xlu1 %397 }
 0x1a0   :  { %355 = vadd.xlane.f32.xlu1 %v354_v9  ;;  %v451_v10 = vsel %vm320_vm2, %v398_v8, 0.0 }
 0x1a1   :  { %452 = vadd.xlane.f32.xlu0 %v451_v10 }
 0x1a3   :  { %v394_v11 = vpop.permute.xlu1 %393 }
 0x1a4   :  { %367 = vadd.xlane.f32.xlu1 %v366_v12  ;;  %v445_v13 = vsel %vm320_vm2, %v394_v11, 0.0 }
 0x1a5   :  { %446 = vadd.xlane.f32.xlu0 %v445_v13 }
 0x1a7   :  { %v400_v16 = vpop.permute.xlu1 %399 }
 0x1a8   :  { %361 = vadd.xlane.f32.xlu1 %v360_v14  ;;  %v454_v18 = vsel %vm320_vm2, %v400_v16, 0.0 }
 0x1ab   :  { %v396_v19 = vpop.permute.xlu1 %395 }
 0x1ac   :  { %443 = vadd.xlane.f32.xlu1 %v442_v15  ;;  %v448_v20 = vsel %vm320_vm2, %v396_v19, 0.0 }
 0x1b0   :  { %437 = vadd.xlane.f32.xlu1 %v436_v17 }
 0x1b1   :  { %v1046_v27 = vpop.xlane.xlu0 %346 }
 0x1b4   :  { %455 = vadd.xlane.f32.xlu1 %v454_v18 }
 0x1b5   :  { %v416_v30 = vpop.permute.xlu0 %415 }
 0x1b6   :  { %v478_v51 = vsel %vm320_vm2, %v416_v30, 0.0 }
 0x1b8   :  { %449 = vadd.xlane.f32.xlu1 %v448_v20 }
 0x1dc   :  { %v1048_v28 = vpop.xlane.xlu1 %343 }
 0x1e0   :  { %v1050_v29 = vpop.xlane.xlu1 %337 }
 0x1e4   :  { %v406_v31 = vpop.permute.xlu1 %405 }
 0x1e5   :  { %v463_v32 = vsel %vm320_vm2, %v406_v31, 0.0 }
 0x1e6   :  { %464 = vadd.xlane.f32.xlu0 %v463_v32  ;;  %v1053_v33 = vpop.xlane.xlu0 %352 }
 0x1e8   :  { %v408_v34 = vpop.permute.xlu1 %407 }
 0x1e9   :  { %v466_v35 = vsel %vm320_vm2, %v408_v34, 0.0 }
 0x1ea   :  { %467 = vadd.xlane.f32.xlu1 %v466_v35  ;;  %458 = vadd.xlane.f32.xlu0 %v457_v36  ;;  %v1057_v37 = vpop.xlane.xlu0 %358 }
 0x1ec   :  { %v404_v38 = vpop.permute.xlu1 %403 }
 0x1ed   :  { %v460_v39 = vsel %vm320_vm2, %v404_v38, 0.0 }
 0x1ee   :  { %461 = vadd.xlane.f32.xlu1 %v460_v39  ;;  %v1060_v40 = vpop.xlane.xlu0 %364 }
 0x1f0   :  { %v414_v41 = vpop.permute.xlu1 %413 }
 0x1f1   :  { %v475_v50 = vsel %vm320_vm2, %v414_v41, 0.0 }
 0x1f2   :  { %v441_v43 = vpop.xlane.xlu0 %440 }
 0x1f3   :  { %v484_v44 = vsel %vm481_vm4, %v329_v21, %v441_v43 }
 0x1f4   :  { %501 = vst.msk [vmem:[%s1189_s9 + $0x10] sm:$0xff] %vm498_vm5, %v484_v44  ;;  %v410_v45 = vpop.permute.xlu1 %409 }
 0x1f5   :  { %v469_v46 = vsel %vm320_vm2, %v410_v45, 0.0 }
 0x1f6   :  { %470 = vadd.xlane.f32.xlu0 %v469_v46  ;;  %v435_v42 = vpop.xlane.xlu0 %434 }
 0x1f7   :  { %v482_v47 = vsel %vm481_vm4, %v323_v22, %v435_v42 }
 0x1f8   :  { %499 = vst.msk [vmem:[%s1189_s9] sm:$0xff] %vm498_vm5, %v482_v47  ;;  %v412_v48 = vpop.permute.xlu1 %411 }
 0x1f9   :  { %v472_v49 = vsel %vm320_vm2, %v412_v48, 0.0 }
 0x1fa   :  { %473 = vadd.xlane.f32.xlu1 %v472_v49  ;;  %476 = vadd.xlane.f32.xlu0 %v475_v50 }
 0x1fe   :  { %479 = vadd.xlane.f32.xlu1 %v478_v51 }
 0x1ff   :  { %669 = shalt.err (!%p666_p4)
}
 0x200   :  { %s670_s26 = scalar_lea.hbm %s1188_s8, 128 }
 0x201   :  { %p671_p5 = scmp.ne.s32.totalorder %s1188_s8, %s670_s26  ;;  %p674_p6 = scmp.lt.u32.totalorder %s670_s26, %s1188_s8 }
 0x203   :  { %p676_p7 = pnand %p674_p6, %p671_p5 }
 0x205   :  { %679 = shalt.err (!%p676_p7)
}
 0x206   :  { %s712_s0 = smov 64   ;;  %s713_s11 = smov 4  }
 0x207   :  { %543 = dma.vmem_to_hbm [thread:$0]  %s538_s1, 128, %s1188_s8, [#allocation3], %s712_s0, %s712_s0, %s713_s11  }
 0x208   :  { %s680_s14 = scalar_lea.vmem %s553_s23, 32  ;;  %p685_p9 = scmp.lt.s32.totalorder %s553_s23, %s553_s23 }
 0x209   :  { %p681_p8 = scmp.ne.s32.totalorder %s553_s23, %s680_s14  ;;  %p686_p10 = scmp.lt.s32.totalorder %s680_s14, %s680_s14 }
 0x20b   :  { %p687_p11 = por %p686_p10, %p685_p9 }
 0x20d   :  { %p688_p12 = pnand %p687_p11, %p681_p8 }
 0x20f   :  { %691 = shalt.err (!%p688_p12)
}
 0x210   :  { %s692_s16 = scalar_lea.hbm %s1190_s10, 32 }
 0x211   :  { %p693_p13 = scmp.ne.s32.totalorder %s1190_s10, %s692_s16  ;;  %p696_p0 = scmp.lt.u32.totalorder %s692_s16, %s1190_s10 }
 0x213   :  { %p698_p1 = pnand %p696_p0, %p693_p13 }
 0x215   :  { %701 = shalt.err (!%p698_p1)
}
 0x216   :  { %555 = dma.vmem_to_hbm [thread:$0]  %s553_s23, 32, %s1190_s10, [#allocation5]  }
 0x229   :  { %v350_v52 = vpop.xlane.xlu1 %349 }
 0x22d   :  { %v356_v53 = vpop.xlane.xlu1 %355 }
 0x22e   :  { %v453_v54 = vpop.xlane.xlu0 %452 }
 0x22f   :  { %v488_v55 = vsel %vm481_vm4, %v1042_v24, %v453_v54 }
 0x230   :  { %505 = vst.msk [vmem:[%s1189_s9 + $0x30] sm:$0xff] %vm498_vm5, %v488_v55 }
 0x231   :  { %v368_v56 = vpop.xlane.xlu1 %367 }
 0x232   :  { %v447_v57 = vpop.xlane.xlu0 %446 }
 0x233   :  { %v486_v58 = vsel %vm481_vm4, %v1044_v25, %v447_v57 }
 0x234   :  { %503 = vst.msk [vmem:[%s1189_s9 + $0x20] sm:$0xff] %vm498_vm5, %v486_v58 }
 0x235   :  { %v362_v59 = vpop.xlane.xlu1 %361 }
 0x239   :  { %v444_v60 = vpop.xlane.xlu1 %443 }
 0x23a   :  { %v485_v61 = vsel %vm481_vm4, %v1040_v23, %v444_v60 }
 0x23b   :  { %502 = vst.msk [vmem:[%s1189_s9 + $0x18] sm:$0xff] %vm498_vm5, %v485_v61 }
 0x23d   :  { %v438_v62 = vpop.xlane.xlu1 %437 }
 0x23e   :  { %v483_v63 = vsel %vm481_vm4, %v1024_v6, %v438_v62 }
 0x23f   :  { %500 = vst.msk [vmem:[%s1189_s9 + $0x8] sm:$0xff] %vm498_vm5, %v483_v63 }
 0x241   :  { %v456_v0 = vpop.xlane.xlu1 %455 }
 0x242   :  { %v489_v1 = vsel %vm481_vm4, %v1048_v28, %v456_v0 }
 0x243   :  { %506 = vst.msk [vmem:[%s1189_s9 + $0x38] sm:$0xff] %vm498_vm5, %v489_v1 }
 0x245   :  { %v450_v2 = vpop.xlane.xlu1 %449 }
 0x246   :  { %v487_v3 = vsel %vm481_vm4, %v1050_v29, %v450_v2 }
 0x247   :  { %504 = vst.msk [vmem:[%s1189_s9 + $0x28] sm:$0xff] %vm498_vm5, %v487_v3 }
 0x273   :  { %v465_v4 = vpop.xlane.xlu0 %464 }
 0x274   :  { %v492_v5 = vsel %vm481_vm4, %v1053_v33, %v465_v4 }
 0x275   :  { %509 = vst.msk [vmem:[%s1189_s9 + $0x50] sm:$0xff] %vm498_vm5, %v492_v5 }
 0x277   :  { %v468_v6 = vpop.xlane.xlu1 %467  ;;  %v459_v7 = vpop.xlane.xlu0 %458 }
 0x278   :  { %v493_v8 = vsel %vm481_vm4, %v356_v53, %v468_v6  ;;  %v490_v9 = vsel %vm481_vm4, %v1046_v27, %v459_v7 }
 0x279   :  { %510 = vst.msk [vmem:[%s1189_s9 + $0x58] sm:$0xff] %vm498_vm5, %v493_v8  ;;  %507 = vst.msk [vmem:[%s1189_s9 + $0x40] sm:$0xff] %vm498_vm5, %v490_v9 }
 0x27b   :  { %v462_v10 = vpop.xlane.xlu1 %461 }
 0x27c   :  { %v491_v11 = vsel %vm481_vm4, %v350_v52, %v462_v10 }
 0x27d   :  { %508 = vst.msk [vmem:[%s1189_s9 + $0x48] sm:$0xff] %vm498_vm5, %v491_v11 }
 0x283   :  { %v471_v12 = vpop.xlane.xlu0 %470 }
 0x284   :  { %v494_v13 = vsel %vm481_vm4, %v1057_v37, %v471_v12 }
 0x285   :  { %511 = vst.msk [vmem:[%s1189_s9 + $0x60] sm:$0xff] %vm498_vm5, %v494_v13 }
 0x287   :  { %v474_v14 = vpop.xlane.xlu1 %473  ;;  %v477_v15 = vpop.xlane.xlu0 %476 }
 0x288   :  { %v495_v16 = vsel %vm481_vm4, %v362_v59, %v474_v14  ;;  %v496_v17 = vsel %vm481_vm4, %v1060_v40, %v477_v15 }
 0x289   :  { %512 = vst.msk [vmem:[%s1189_s9 + $0x68] sm:$0xff] %vm498_vm5, %v495_v16  ;;  %513 = vst.msk [vmem:[%s1189_s9 + $0x70] sm:$0xff] %vm498_vm5, %v496_v17 }
 0x28b   :  { %v480_v18 = vpop.xlane.xlu1 %479 }
 0x28c   :  { %v497_v19 = vsel %vm481_vm4, %v368_v56, %v480_v18 }
 0x28d   :  { %514 = vst.msk [vmem:[%s1189_s9 + $0x78] sm:$0xff] %vm498_vm5, %v497_v19 }
 0x28e   :  { %702 = dma.done.wait [#allocation3], 128  }
 0x28f   :  { %703 = vsyncadd [#allocation3], 4294967168 }
 0x290   :  { %704 = dma.done.wait [#allocation5], 32  }
 0x291   :  { %705 = vsyncadd [#allocation5], 4294967264 }
 0x292   :  { %566 = vsyncpa [#allocation3], 1 }
 0x293   :  { %567 = vsyncpa [#allocation5], 1 }

</bundles_post_ra>
